<compile_context>
chip_gen: v7x
topology: tpu7x:2x2x1
jax: 0.10.0
libtpu: 0.0.40
codegen_flags: <defaults>
</compile_context>

<pallas_src>
import math

import jax
import jax.numpy as jnp
from jax import lax
from jax.experimental import pallas as pl
from jax.experimental.pallas import tpu as pltpu

_INV_SQRT2 = 0.7071067811865476
_ERF_P = 0.3275911
# Abramowitz & Stegun 7.1.26 coefficients, pre-halved so the Horner chain evaluates 0.5*poly(t).
_ERF_A = (0.5 * 0.254829592, 0.5 * -0.284496736, 0.5 * 1.421413741,
          0.5 * -1.453152027, 0.5 * 1.061405429)


def _gelu_exact(x):
    """Exact (erf) GELU, |error| < ~1.5e-7, structured for the TPU VLIW slots:
       gelu(x) = x * Phi(x),  Phi = where(x>=0, 1-q, q),
       q = 0.5*poly(t)*exp(-x^2/2),  t = 1/(1 + p*|x|/sqrt(2)).
    exp and the reciprocal go to the EUP; the sign handling is a single select."""
    xa = jnp.abs(x)
    den = 1.0 + (_ERF_P * _INV_SQRT2) * xa
    # Exact reciprocal (EUP + refinement).  approx=True would shave ~2-3 VALU ops/element but
    # risks the 1e-4 parity tolerance after LayerNorm amplification.
    t = pl.reciprocal(den, approx=False)
    a1, a2, a3, a4, a5 = _ERF_A
    poly = t * (a1 + t * (a2 + t * (a3 + t * (a4 + t * a5))))
    q = poly * jnp.exp(-0.5 * (x * x))          # exp(-z^2), z = x/sqrt(2)  (EUP)
    phi = jnp.where(x >= 0.0, 1.0 - q, q)
    return x * phi


def _pick_hw_tile(hw, w, cin, cout, itemsize, *, layer_norm, batch,
                  vmem_budget_bytes=20 << 20, max_groups=64):
    """Pick the spatial tile T (lanes) and report its estimated VMEM footprint.

    Constraints: T divides HW; T is a multiple of 128 unless T == HW (the (8,128) rule);
    with LayerNorm T is a multiple of W (groups never straddle a tile) and T/W is capped
    (indicator-matmul FLOPs grow linearly with T/W) without forcing T below ~512 lanes;
    the double-buffered x/out blocks plus Gs / GT*gamma / beta / w / b fit the VMEM budget;
    when B == 1 we prefer >= 2 spatial tiles so a v7x megacore can shard the grid."""
    step = (128 * w) // math.gcd(128, w) if layer_norm else 128
    groups_cap = max(max_groups, -(-512 // w)) if layer_norm else None

    def footprint(t):
        b = 2 * t * (cin + cout) * itemsize               # double-buffered x / out blocks
        b += 2 * (cout * cin + cout) * 4                  # conv weight + bias (f32)
        if layer_norm:
            g = t // w
            b += 2 * (2 * t * g + t) * 4                  # Gs, GT*gamma, beta_t (f32)
        return b

    def valid(t, *, capped):
        if layer_norm and t % w:
            return False
        if t != hw and t % 128:
            return False
        if capped and layer_norm and (t // w) > groups_cap:
            return False
        return footprint(t) <= vmem_budget_bytes

    for capped in (True, False):                          # relax the groups cap if necessary
        cands = [t for t in range(step, hw, step) if hw % t == 0 and valid(t, capped=capped)]
        if valid(hw, capped=capped):
            cands.append(hw)
        if not cands:
            continue
        if batch < 2:                                     # keep both v7x TensorCores busy
            split = [t for t in cands if hw // t >= 2]
            if split:
                t = max(split)
                return t, footprint(t)
        t = max(cands)
        return t, footprint(t)
    return hw, footprint(hw)                              # last resort: single full block


def channel_expander_forward(x_nchw, conv_w, conv_b, ln_gamma=None, ln_beta=None,
                             *, eps=1e-5, layer_norm=True):
    """ChannelExpander.forward.

    x_nchw: (B, Cin, H, W);  conv_w: (Cout, Cin, 1, 1) or (Cout, Cin);  conv_b: (Cout,)
    ln_gamma / ln_beta: (Cout,)  (only used when layer_norm=True)
    """
    B, Cin, H, W = x_nchw.shape
    Cout = conv_w.shape[0]
    HW = H * W

    if layer_norm and W != Cout:
        raise ValueError(
            "nn.LayerNorm(out_channels) applied to an NCHW tensor normalizes the last dim "
            f"(W) and requires W == out_channels (got W={W}, out_channels={Cout}).")

    itemsize = jnp.dtype(x_nchw.dtype).itemsize
    x_flat = x_nchw.reshape(B, Cin, HW)                   # free reshape of contiguous NCHW
    w2d = jnp.asarray(conv_w, jnp.float32).reshape(Cout, Cin)
    b2d = jnp.asarray(conv_b, jnp.float32).reshape(Cout, 1)

    T, fp_bytes = _pick_hw_tile(HW, W, Cin, Cout, itemsize,
                                layer_norm=layer_norm, batch=B)
    n_hw_tiles = HW // T
    vmem_limit = int(min(max(fp_bytes + (8 << 20), 32 << 20), 100 << 20))

    operands = [x_flat, w2d, b2d]
    in_specs = [
        pl.BlockSpec((1, Cin, T), lambda b, t: (b, 0, t)),   # x tile
        pl.BlockSpec((Cout, Cin), lambda b, t: (0, 0)),      # conv weight (grid-invariant)
        pl.BlockSpec((Cout, 1), lambda b, t: (0, 0)),        # conv bias   (grid-invariant)
    ]

    if layer_norm:
        groups = T // W
        grp = jnp.arange(T, dtype=jnp.int32) // W
        ind = (grp[None, :] == jnp.arange(groups, dtype=jnp.int32)[:, None])  # (groups, T)
        # Stats reducer: 1/W folded in, so y@Gs already yields per-group means.
        Gs = ind.T.astype(jnp.float32) * (1.0 / float(W))                     # (T, groups)
        # Group->lane broadcaster with gamma folded in: rstd@GTg == gamma*rstd per lane.
        gamma_lane = jnp.tile(jnp.asarray(ln_gamma, jnp.float32), groups)     # (T,)
        GTg = ind.astype(jnp.float32) * gamma_lane[None, :]                   # (groups, T)
        beta_t = jnp.tile(jnp.asarray(ln_beta, jnp.float32), groups).reshape(1, T)

        operands += [Gs, GTg, beta_t]
        in_specs += [
            pl.BlockSpec((T, groups), lambda b, t: (0, 0)),  # Gs        (grid-invariant)
            pl.BlockSpec((groups, T), lambda b, t: (0, 0)),  # GT*gamma  (grid-invariant)
            pl.BlockSpec((1, T), lambda b, t: (0, 0)),       # beta      (grid-invariant)
        ]

        def kernel(x_ref, w_ref, b_ref, gs_ref, gtg_ref, beta_ref, o_ref):
            x = x_ref[0].astype(jnp.float32)                                   # (Cin, T)
            y = jnp.dot(w_ref[...], x, preferred_element_type=jnp.float32)     # 1x1 conv (MXU)
            y = _gelu_exact(y + b_ref[...])                                    # (Cout, T)
            # LayerNorm over groups of W lanes: independent stats matmuls, then one-shot
            # broadcast matmuls with gamma pre-folded into GTg.
            mean_g = jnp.dot(y, gs_ref[...], preferred_element_type=jnp.float32)      # E[y]
            ey2_g = jnp.dot(y * y, gs_ref[...], preferred_element_type=jnp.float32)   # E[y^2]
            var_g = jnp.maximum(ey2_g - mean_g * mean_g, 0.0)
            rstd_g = lax.rsqrt(var_g + eps)                                            # EUP
            scale = jnp.dot(rstd_g, gtg_ref[...],
                            preferred_element_type=jnp.float32)                # gamma*rstd
            shift = jnp.dot(-mean_g * rstd_g, gtg_ref[...],
                            preferred_element_type=jnp.float32)                # -gamma*mean*rstd
            o_ref[0] = (y * scale + (shift + beta_ref[...])).astype(o_ref.dtype)
    else:
        groups = 0

        def kernel(x_ref, w_ref, b_ref, o_ref):
            x = x_ref[0].astype(jnp.float32)                                   # (Cin, T)
            y = jnp.dot(w_ref[...], x, preferred_element_type=jnp.float32)
            o_ref[0] = _gelu_exact(y + b_ref[...]).astype(o_ref.dtype)

    flops = 2 * B * HW * Cin * Cout + 30 * B * Cout * HW
    if layer_norm:
        flops += 8 * B * Cout * HW * groups
    cost = pl.CostEstimate(
        flops=int(flops),
        transcendentals=int(2 * B * Cout * HW),
        bytes_accessed=int(B * HW * (Cin + Cout) * itemsize
                           + Cout * (Cin + 1) * 4
                           + (2 * T * groups + T) * 4),
    )

    out = pl.pallas_call(
        kernel,
        out_shape=jax.ShapeDtypeStruct((B, Cout, HW), x_nchw.dtype),
        grid=(B, n_hw_tiles),
        in_specs=in_specs,
        out_specs=pl.BlockSpec((1, Cout, T), lambda b, t: (b, 0, t)),
        compiler_params=pltpu.CompilerParams(
            dimension_semantics=("parallel", "parallel"),
            vmem_limit_bytes=vmem_limit),
        cost_estimate=cost,
    )(*operands)

    return out.reshape(B, Cout, H, W)


def channel_expander_ref(x_nchw, conv_w, conv_b, ln_gamma=None, ln_beta=None,
                         eps=1e-5, layer_norm=True):
    """Pure-JAX reference mirroring the PyTorch forward."""
    Cout, Cin = conv_w.shape[0], conv_w.shape[1]
    w2d = jnp.asarray(conv_w, jnp.float32).reshape(Cout, Cin)
    y = jnp.einsum("bchw,oc->bohw", x_nchw.astype(jnp.float32), w2d)
    y = y + jnp.asarray(conv_b, jnp.float32).reshape(1, -1, 1, 1)
    y = jax.nn.gelu(y, approximate=False)                 # exact GELU, like nn.GELU()
    if layer_norm:
        mean = jnp.mean(y, axis=-1, keepdims=True)
        var = jnp.mean(jnp.square(y - mean), axis=-1, keepdims=True)
        y = (y - mean) / jnp.sqrt(var + eps) * ln_gamma + ln_beta
    return y.astype(x_nchw.dtype)


if __name__ == "__main__":
    # Small shapes consistent with the module.  NOTE: PyTorch's LayerNorm(out_channels) on an
    # NCHW tensor normalizes the last dim (W) and requires W == out_channels.
    B, Cin, H, W = 2, 4, 16, 16
    Cout = 16

    key = jax.random.PRNGKey(0)
    kx, kw, kb, kg, kbt = jax.random.split(key, 5)
    x = jax.random.normal(kx, (B, Cin, H, W), dtype=jnp.float32)
    conv_w = jax.random.normal(kw, (Cout, Cin, 1, 1), dtype=jnp.float32) * 0.2
    conv_b = jax.random.normal(kb, (Cout,), dtype=jnp.float32) * 0.1
    ln_gamma = 1.0 + 0.1 * jax.random.normal(kg, (Cout,), dtype=jnp.float32)
    ln_beta = 0.1 * jax.random.normal(kbt, (Cout,), dtype=jnp.float32)

    # LayerNorm path (default module config).
    out = channel_expander_forward(x, conv_w, conv_b, ln_gamma, ln_beta)
    out = jax.block_until_ready(out)
    ref = channel_expander_ref(x, conv_w, conv_b, ln_gamma, ln_beta)
    assert out.shape == (B, Cout, H, W)
    max_err = float(jnp.max(jnp.abs(out - ref)))
    assert jnp.allclose(out, ref, atol=1e-4, rtol=1e-4), f"LN mismatch, max_err={max_err}"

    # No-LayerNorm path (layer_norm=False: no G/GT/gamma/beta operands at all).
    out_nl = channel_expander_forward(x, conv_w, conv_b, layer_norm=False)
    out_nl = jax.block_until_ready(out_nl)
    ref_nl = channel_expander_ref(x, conv_w, conv_b, layer_norm=False)
    max_err_nl = float(jnp.max(jnp.abs(out_nl - ref_nl)))
    assert jnp.allclose(out_nl, ref_nl, atol=1e-4, rtol=1e-4), \
        f"no-LN mismatch, max_err={max_err_nl}"

    print("KERNEL_OK")
</pallas_src>

<mosaic_0001>
module attributes {stable_mosaic.version = 11 : i64} {
  func.func @kernel(%arg0: i32, %arg1: i32, %arg2: memref<1x4x256xf32, #tpu.memory_space<vmem>>, %arg3: memref<16x4xf32, #tpu.memory_space<vmem>>, %arg4: memref<16x1xf32, #tpu.memory_space<vmem>>, %arg5: memref<256x16xf32, #tpu.memory_space<vmem>>, %arg6: memref<16x256xf32, #tpu.memory_space<vmem>>, %arg7: memref<1x256xf32, #tpu.memory_space<vmem>>, %arg8: memref<1x16x256xf32, #tpu.memory_space<vmem>>) attributes {dimension_semantics = [#tpu.dimension_semantics<parallel>, #tpu.dimension_semantics<parallel>], iteration_bounds = array<i64: 2, 1>, scalar_prefetch = 0 : i64, scratch_operands = 0 : i64, tpu.core_type = #tpu.core_type<tc>, window_params = [{transform_indices = @transform_0, window_bounds = array<i64: 1, 4, 256>}, {pipeline_mode = #tpu.pipeline_mode<synchronous>, transform_indices = @transform_1, window_bounds = array<i64: 16, 4>}, {pipeline_mode = #tpu.pipeline_mode<synchronous>, transform_indices = @transform_2, window_bounds = array<i64: 16, 1>}, {pipeline_mode = #tpu.pipeline_mode<synchronous>, transform_indices = @transform_3, window_bounds = array<i64: 256, 16>}, {pipeline_mode = #tpu.pipeline_mode<synchronous>, transform_indices = @transform_4, window_bounds = array<i64: 16, 256>}, {pipeline_mode = #tpu.pipeline_mode<synchronous>, transform_indices = @transform_5, window_bounds = array<i64: 1, 256>}, {transform_indices = @transform_6, window_bounds = array<i64: 1, 16, 256>}]} {
    %c0 = arith.constant 0 : index
    %c0_0 = arith.constant 0 : index
    %c0_1 = arith.constant 0 : index
    %0 = vector.load %arg2[%c0, %c0_0, %c0_1] : memref<1x4x256xf32, #tpu.memory_space<vmem>>, vector<1x4x256xf32>
    %1 = vector.shape_cast %0 : vector<1x4x256xf32> to vector<4x256xf32>
    %c0_2 = arith.constant 0 : index
    %c0_3 = arith.constant 0 : index
    %2 = vector.load %arg3[%c0_2, %c0_3] : memref<16x4xf32, #tpu.memory_space<vmem>>, vector<16x4xf32>
    %cst = arith.constant dense<0.000000e+00> : vector<16x256xf32>
    %3 = tpu.matmul %2, %1, %cst {dimension_numbers = #tpu.dot_dimension_numbers<[1], [0], [0], [1], [0, 0, 1, 1], [], []>} : vector<16x4xf32>, vector<4x256xf32>, vector<16x256xf32> -> vector<16x256xf32>
    %c0_4 = arith.constant 0 : index
    %c0_5 = arith.constant 0 : index
    %4 = vector.load %arg4[%c0_4, %c0_5] : memref<16x1xf32, #tpu.memory_space<vmem>>, vector<16x1xf32>
    %5 = vector.broadcast %4 : vector<16x1xf32> to vector<16x256xf32>
    %6 = arith.addf %3, %5 : vector<16x256xf32>
    %7 = math.absf %6 : vector<16x256xf32>
    %cst_6 = arith.constant 0.231641889 : f32
    %8 = vector.broadcast %cst_6 : f32 to vector<16x256xf32>
    %9 = arith.mulf %8, %7 : vector<16x256xf32>
    %cst_7 = arith.constant 1.000000e+00 : f32
    %10 = vector.broadcast %cst_7 : f32 to vector<16x256xf32>
    %11 = arith.addf %10, %9 : vector<16x256xf32>
    %12 = tpu.reciprocal %11 : vector<16x256xf32> -> vector<16x256xf32>
    %cst_8 = arith.constant 0.53070271 : f32
    %13 = vector.broadcast %cst_8 : f32 to vector<16x256xf32>
    %14 = arith.mulf %12, %13 : vector<16x256xf32>
    %cst_9 = arith.constant -0.72657603 : f32
    %15 = vector.broadcast %cst_9 : f32 to vector<16x256xf32>
    %16 = arith.addf %15, %14 : vector<16x256xf32>
    %17 = arith.mulf %12, %16 : vector<16x256xf32>
    %cst_10 = arith.constant 0.710706889 : f32
    %18 = vector.broadcast %cst_10 : f32 to vector<16x256xf32>
    %19 = arith.addf %18, %17 : vector<16x256xf32>
    %20 = arith.mulf %12, %19 : vector<16x256xf32>
    %cst_11 = arith.constant -0.142248362 : f32
    %21 = vector.broadcast %cst_11 : f32 to vector<16x256xf32>
    %22 = arith.addf %21, %20 : vector<16x256xf32>
    %23 = arith.mulf %12, %22 : vector<16x256xf32>
    %cst_12 = arith.constant 0.127414793 : f32
    %24 = vector.broadcast %cst_12 : f32 to vector<16x256xf32>
    %25 = arith.addf %24, %23 : vector<16x256xf32>
    %26 = arith.mulf %12, %25 : vector<16x256xf32>
    %27 = arith.mulf %6, %6 : vector<16x256xf32>
    %cst_13 = arith.constant -5.000000e-01 : f32
    %28 = vector.broadcast %cst_13 : f32 to vector<16x256xf32>
    %29 = arith.mulf %28, %27 : vector<16x256xf32>
    %30 = math.exp %29 : vector<16x256xf32>
    %31 = arith.mulf %26, %30 : vector<16x256xf32>
    %cst_14 = arith.constant 0.000000e+00 : f32
    %32 = vector.broadcast %cst_14 : f32 to vector<16x256xf32>
    %33 = arith.cmpf oge, %6, %32 : vector<16x256xf32>
    %cst_15 = arith.constant 1.000000e+00 : f32
    %34 = vector.broadcast %cst_15 : f32 to vector<16x256xf32>
    %35 = arith.subf %34, %31 : vector<16x256xf32>
    %36 = arith.select %33, %35, %31 : vector<16x256xi1>, vector<16x256xf32>
    %37 = arith.mulf %6, %36 : vector<16x256xf32>
    %c0_16 = arith.constant 0 : index
    %c0_17 = arith.constant 0 : index
    %38 = vector.load %arg5[%c0_16, %c0_17] : memref<256x16xf32, #tpu.memory_space<vmem>>, vector<256x16xf32>
    %cst_18 = arith.constant dense<0.000000e+00> : vector<16x16xf32>
    %39 = tpu.matmul %37, %38, %cst_18 {dimension_numbers = #tpu.dot_dimension_numbers<[1], [0], [0], [1], [0, 0, 1, 1], [], []>} : vector<16x256xf32>, vector<256x16xf32>, vector<16x16xf32> -> vector<16x16xf32>
    %40 = arith.mulf %37, %37 : vector<16x256xf32>
    %c0_19 = arith.constant 0 : index
    %c0_20 = arith.constant 0 : index
    %41 = vector.load %arg5[%c0_19, %c0_20] : memref<256x16xf32, #tpu.memory_space<vmem>>, vector<256x16xf32>
    %cst_21 = arith.constant dense<0.000000e+00> : vector<16x16xf32>
    %42 = tpu.matmul %40, %41, %cst_21 {dimension_numbers = #tpu.dot_dimension_numbers<[1], [0], [0], [1], [0, 0, 1, 1], [], []>} : vector<16x256xf32>, vector<256x16xf32>, vector<16x16xf32> -> vector<16x16xf32>
    %43 = arith.mulf %39, %39 : vector<16x16xf32>
    %44 = arith.subf %42, %43 : vector<16x16xf32>
    %cst_22 = arith.constant 0.000000e+00 : f32
    %45 = vector.broadcast %cst_22 : f32 to vector<16x16xf32>
    %46 = arith.maximumf %44, %45 : vector<16x16xf32>
    %cst_23 = arith.constant 9.99999974E-6 : f32
    %47 = vector.broadcast %cst_23 : f32 to vector<16x16xf32>
    %48 = arith.addf %46, %47 : vector<16x16xf32>
    %49 = math.rsqrt %48 : vector<16x16xf32>
    %c0_24 = arith.constant 0 : index
    %c0_25 = arith.constant 0 : index
    %50 = vector.load %arg6[%c0_24, %c0_25] : memref<16x256xf32, #tpu.memory_space<vmem>>, vector<16x256xf32>
    %cst_26 = arith.constant dense<0.000000e+00> : vector<16x256xf32>
    %51 = tpu.matmul %49, %50, %cst_26 {dimension_numbers = #tpu.dot_dimension_numbers<[1], [0], [0], [1], [0, 0, 1, 1], [], []>} : vector<16x16xf32>, vector<16x256xf32>, vector<16x256xf32> -> vector<16x256xf32>
    %cst_27 = arith.constant 0.000000e+00 : f32
    %52 = vector.broadcast %cst_27 : f32 to vector<16x16xf32>
    %53 = arith.subf %52, %39 : vector<16x16xf32>
    %54 = arith.mulf %53, %49 : vector<16x16xf32>
    %c0_28 = arith.constant 0 : index
    %c0_29 = arith.constant 0 : index
    %55 = vector.load %arg6[%c0_28, %c0_29] : memref<16x256xf32, #tpu.memory_space<vmem>>, vector<16x256xf32>
    %cst_30 = arith.constant dense<0.000000e+00> : vector<16x256xf32>
    %56 = tpu.matmul %54, %55, %cst_30 {dimension_numbers = #tpu.dot_dimension_numbers<[1], [0], [0], [1], [0, 0, 1, 1], [], []>} : vector<16x16xf32>, vector<16x256xf32>, vector<16x256xf32> -> vector<16x256xf32>
    %57 = arith.mulf %37, %51 : vector<16x256xf32>
    %c0_31 = arith.constant 0 : index
    %c0_32 = arith.constant 0 : index
    %58 = vector.load %arg7[%c0_31, %c0_32] : memref<1x256xf32, #tpu.memory_space<vmem>>, vector<1x256xf32>
    %59 = vector.broadcast %58 : vector<1x256xf32> to vector<16x256xf32>
    %60 = arith.addf %56, %59 : vector<16x256xf32>
    %61 = arith.addf %57, %60 : vector<16x256xf32>
    %c0_33 = arith.constant 0 : index
    %c0_34 = arith.constant 0 : index
    %c0_35 = arith.constant 0 : index
    %62 = vector.load %arg8[%c0_33, %c0_34, %c0_35] : memref<1x16x256xf32, #tpu.memory_space<vmem>>, vector<1x16x256xf32>
    %63 = vector.shape_cast %62 : vector<1x16x256xf32> to vector<16x256xf32>
    %64 = vector.shape_cast %61 : vector<16x256xf32> to vector<1x16x256xf32>
    tpu.vector_store %arg8[%c0_33, %c0_34, %c0_35], %64 {strides = array<i32>} : memref<1x16x256xf32, #tpu.memory_space<vmem>>, vector<1x16x256xf32>,
    return
  }
  func.func @transform_0(%arg0: i32, %arg1: i32) -> (i32, i32, i32) {
    %c0_i32 = arith.constant 0 : i32
    %c0_i32_0 = arith.constant 0 : i32
    return %arg0, %c0_i32, %arg1 : i32, i32, i32
  }
  func.func @transform_1(%arg0: i32, %arg1: i32) -> (i32, i32) {
    %c0_i32 = arith.constant 0 : i32
    %c0_i32_0 = arith.constant 0 : i32
    %c0_i32_1 = arith.constant 0 : i32
    return %c0_i32, %c0_i32_0 : i32, i32
  }
  func.func @transform_2(%arg0: i32, %arg1: i32) -> (i32, i32) {
    %c0_i32 = arith.constant 0 : i32
    %c0_i32_0 = arith.constant 0 : i32
    %c0_i32_1 = arith.constant 0 : i32
    return %c0_i32, %c0_i32_0 : i32, i32
  }
  func.func @transform_3(%arg0: i32, %arg1: i32) -> (i32, i32) {
    %c0_i32 = arith.constant 0 : i32
    %c0_i32_0 = arith.constant 0 : i32
    %c0_i32_1 = arith.constant 0 : i32
    return %c0_i32, %c0_i32_0 : i32, i32
  }
  func.func @transform_4(%arg0: i32, %arg1: i32) -> (i32, i32) {
    %c0_i32 = arith.constant 0 : i32
    %c0_i32_0 = arith.constant 0 : i32
    %c0_i32_1 = arith.constant 0 : i32
    return %c0_i32, %c0_i32_0 : i32, i32
  }
  func.func @transform_5(%arg0: i32, %arg1: i32) -> (i32, i32) {
    %c0_i32 = arith.constant 0 : i32
    %c0_i32_0 = arith.constant 0 : i32
    %c0_i32_1 = arith.constant 0 : i32
    return %c0_i32, %c0_i32_0 : i32, i32
  }
  func.func @transform_6(%arg0: i32, %arg1: i32) -> (i32, i32, i32) {
    %c0_i32 = arith.constant 0 : i32
    %c0_i32_0 = arith.constant 0 : i32
    return %arg0, %c0_i32, %arg1 : i32, i32, i32
  }
}

</mosaic_0001>

<bundles_post_ra>
// kernel: tpu_custom_call.1
= control target key start
LH: loop header
LB: loop body
LE: loop exit
PB: predicated region body
PF: predicated region fallthrough
CT: control target
= control target key end

     0   :  { %11 = vsyncpa [#allocation3], 0  ;;  %s1637_s0 = inlined_call_operand.vmem [shape: f32[2,4,256], index: 0, kind: input, shape index: {}]   ;;  %s1638_s1 = inlined_call_operand.vmem [shape: f32[16,4], index: 1, kind: input, shape index: {}]   ;;  %s1639_s2 = inlined_call_operand.vmem [shape: f32[16,1], index: 2, kind: input, shape index: {}]   ;;  %s1640_s3 = inlined_call_operand.vmem [shape: f32[256,16], index: 3, kind: input, shape index: {}]   ;;  %s1641_s4 = inlined_call_operand.vmem [shape: f32[16,256], index: 4, kind: input, shape index: {}]   ;;  %s1642_s5 = inlined_call_operand.vmem [shape: f32[1,256], index: 5, kind: input, shape index: {}]   ;;  %s1643_s6 = inlined_call_operand.hbm [shape: f32[2,16,256], index: 6, kind: output, shape index: {}]  }
   0x1   :  { %13 = vsyncpa [#allocation3 + $0x1], 0  ;;  %s1337_s21 = smov 0   ;;  %s1339_s22 = smov 0  }
   0x2   :  { %s1341_s23 = smov 0   ;;  %s1343_s24 = smov 0  }
   0x3   :  { %s1345_s25 = smov 0   ;;  %s1347_s26 = smov 0  }
   0x4 LB: > { %s965_s27 = sadd.s32 4294967295, %s1295_s26   ;;  %s966_s28 = sadd.s32 4294967294, %s1295_s26   ;;  %s1295_s26 = sphi %s1347_s26, %s19_s26   ;;  %s1291_s25 = sphi %s1345_s25, %s1650_s25   ;;  %s1287_s24 = sphi %s1343_s24, %s1649_s24   ;;  %s1283_s23 = sphi %s1341_s23, %s1648_s23   ;;  %s1279_s22 = sphi %s1339_s22, %s1647_s22   ;;  %s1275_s21 = sphi %s1337_s21, %s1646_s21  }
   0x5   : > { %s31_s29 = sadd.s32 1, %s1291_s25  ;;  %s173_s30 = sadd.s32 1, %s1283_s23 }
   0x6   : > { %p33_p0 = scmp.ge.s32.totalorder %s31_s29, 2  ;;  %p183_p1 = scmp.ne.s32.totalorder %s1283_s23, %s1279_s22 }
   0x7   : > { %p184_p2 = scmp.eq.s32.totalorder %s965_s27, 1  ;;  %p189_p3 = scmp.ne.s32.totalorder %s1279_s22, %s1275_s21 }
   0x8   : > { %s1652_s29 = smov (%p33_p0, %s31_s29), 0  ;;  %p190_p5 = scmp.eq.s32.totalorder %s966_s28, 1 }
   0x9   : > { %p1377_p4 = por %p184_p2, %p183_p1  ;;  %s168_s8 = ssub.s32 %s1291_s25, %s1652_s29 }
   0xa   : > { %p969_p6 = scmp.ge.s32.totalorder %s1295_s26, 1  ;;  %p171_p7 = scmp.eq.s32.totalorder %s168_s8, 0 }
   0xb   : > { %p1384_p8 = por %p190_p5, %p189_p3  ;;  %p236_p9 = scmp.lt.s32.totalorder %s1295_s26, 3 }
   0xc   : > { %s1390_s10 = scalar_select %p171_p7, %s1283_s23, %s173_s30  }
   0xd   : > { %p237_p10 = pnand %p969_p6, %p236_p9 }
   0xe   : > { %p271_p11 = scmp.lt.s32.totalorder (!%p237_p10), %s1287_s24, 1  ;;  %v1297_v0 = vmov (!%p237_p10), 0.0   ;;  %v284_v1 = vld [vmem:[%s1639_s2] sm:$0xff] (!%p237_p10)  ;;  %v1298_v2 = vmov (!%p237_p10), 0   ;;  %v285_v3 = vld [vmem:[%s1639_s2 + $0x8] sm:$0xff] (!%p237_p10)  ;;  %vm305_vm0 = vcmask (!%p237_p10), 1043456  }
   0xf   : > { %240 = sbr.rel (%p237_p10) target bundleno = 761 (0x2f9), region = 44  ;;  %374 = vmatprep.mubr.f32.mxu0 (!%p237_p10), %v1297_v0  ;;  %1195 = vset.pattern.permute.xlu0 (!%p237_p10), %v1298_v2  ;;  %v282_v6 = vld [vmem:[%s1638_s1] sm:$0xff] (!%p237_p10)  ;;  %vm298_vm1 = vcmask (!%p237_p10), 31744   ;;  %v283_v7 = vld [vmem:[%s1638_s1 + $0x8] sm:$0xff] (!%p237_p10)  ;;  %v493_v14 = vld [vmem:[%s1640_s3 + $0x90] sm:$0xff] (!%p237_p10)  ;;  %vm675_vm6 = vcmask (!%p237_p10), 130048  }
  0x10   : > { %288 = vperm.xlu0 (!%p237_p10), %1195, %v284_v1   ;;  %v491_v8 = vld [vmem:[%s1640_s3 + $0x80] sm:$0xff] (!%p237_p10)  ;;  %v492_v9 = vld [vmem:[%s1640_s3 + $0x88] sm:$0xff] (!%p237_p10)  ;;  %v494_v15 = vld [vmem:[%s1640_s3 + $0x98] sm:$0xff] (!%p237_p10)  ;;  %s987_s18 = sshll.u32 (!%p237_p10), %s1287_s24, 9  ;;  %s1299_s30 = smov (!%p237_p10), [#allocation2]  }
  0x11   : > { %v1064_v10 = vpack.c.bf16 (!%p237_p10), %v492_v9, %v491_v8  ;;  %v475_v11 = vld [vmem:[%s1640_s3] sm:$0xff] (!%p237_p10)  ;;  %v476_v12 = vld [vmem:[%s1640_s3 + $0x8] sm:$0xff] (!%p237_p10)  ;;  %v477_v16 = vld [vmem:[%s1640_s3 + $0x10] sm:$0xff] (!%p237_p10)  ;;  %v1068_v17 = vpack.c.bf16 (!%p237_p10), %v494_v15, %v493_v14  ;;  %s1587_s27 = scalar_lea.hbm (!%p237_p10), %s1643_s6, %s987_s18  ;;  %s1221_s8 = sshll.u32 (!%p237_p10), %s1299_s30, 4  ;;  %s1222_s8 = int_to_ptr.vmem [resolvable:$false] %s1221_s8 }
  0x12   : > { %v1066_v13 = vpack.c.bf16 (!%p237_p10), %v476_v12, %v475_v11  ;;  %v478_v18 = vld [vmem:[%s1640_s3 + $0x18] sm:$0xff] (!%p237_p10)  ;;  %v495_v19 = vld [vmem:[%s1640_s3 + $0xa0] sm:$0xff] (!%p237_p10)  ;;  %v496_v20 = vld [vmem:[%s1640_s3 + $0xa8] sm:$0xff] (!%p237_p10)  ;;  %s1223_s11 = scalar_lea.vmem (!%p237_p10), %s1222_s8, 1024 }
  0x13   : > { %1065 = vmatprep.subr.bf16.mxu1 (!%p237_p10), %v1064_v10  ;;  %v1070_v21 = vpack.c.bf16 (!%p237_p10), %v478_v18, %v477_v16  ;;  %v1072_v22 = vpack.c.bf16 (!%p237_p10), %v496_v20, %v495_v19  ;;  %v479_v23 = vld [vmem:[%s1640_s3 + $0x20] sm:$0xff] (!%p237_p10)  ;;  %v480_v24 = vld [vmem:[%s1640_s3 + $0x28] sm:$0xff] (!%p237_p10)  ;;  %v497_v25 = vld [vmem:[%s1640_s3 + $0xb0] sm:$0xff] (!%p237_p10) }
  0x14   : > { %293 = vperm.xlu0 (!%p237_p10), %1195, %v285_v3   ;;  %1067 = vmatpush3.bf16.msra.mxu1 (!%p237_p10), %v1066_v13  ;;  %v498_v26 = vld [vmem:[%s1640_s3 + $0xb8] sm:$0xff] (!%p237_p10)  ;;  %v1074_v27 = vpack.c.bf16 (!%p237_p10), %v480_v24, %v479_v23  ;;  %v481_v29 = vld [vmem:[%s1640_s3 + $0x30] sm:$0xff] (!%p237_p10)  ;;  %v499_v31 = vld [vmem:[%s1640_s3 + $0xc0] sm:$0xff] (!%p237_p10) }
  0x15   : > { %1069 = vmatprep.subr.bf16.mxu1 (!%p237_p10), %v1068_v17  ;;  %v1076_v28 = vpack.c.bf16 (!%p237_p10), %v498_v26, %v497_v25  ;;  %v482_v30 = vld [vmem:[%s1640_s3 + $0x38] sm:$0xff] (!%p237_p10)  ;;  %v500_v32 = vld [vmem:[%s1640_s3 + $0xc8] sm:$0xff] (!%p237_p10)  ;;  %v483_v35 = vld [vmem:[%s1640_s3 + $0x40] sm:$0xff] (!%p237_p10) }
  0x16   : > { %s272_s13 = scalar_select %p271_p11, %s1287_s24, 1  ;;  %v1078_v33 = vpack.c.bf16 %v482_v30, %v481_v29  ;;  %v1080_v34 = vpack.c.bf16 %v500_v32, %v499_v31  ;;  %v484_v36 = vld [vmem:[%s1640_s3 + $0x48] sm:$0xff]  ;;  %v501_v37 = vld [vmem:[%s1640_s3 + $0xd0] sm:$0xff]  ;;  %v502_v38 = vld [vmem:[%s1640_s3 + $0xd8] sm:$0xff] }
  0x17   : > { %v1082_v39 = vpack.c.bf16 %v484_v36, %v483_v35  ;;  %v1084_v40 = vpack.c.bf16 %v502_v38, %v501_v37  ;;  %v485_v41 = vld [vmem:[%s1640_s3 + $0x50] sm:$0xff]  ;;  %v486_v42 = vld [vmem:[%s1640_s3 + $0x58] sm:$0xff]  ;;  %v503_v43 = vld [vmem:[%s1640_s3 + $0xe0] sm:$0xff] }
  0x18   : > { %s986_s14 = sshll.u32 %s272_s13, 3  ;;  %1071 = vmatpush3.bf16.msra.mxu1 %v1070_v21  ;;  %v504_v44 = vld [vmem:[%s1640_s3 + $0xe8] sm:$0xff]  ;;  %v1086_v45 = vpack.c.bf16 %v486_v42, %v485_v41  ;;  %v487_v47 = vld [vmem:[%s1640_s3 + $0x60] sm:$0xff]  ;;  %v505_v49 = vld [vmem:[%s1640_s3 + $0xf0] sm:$0xff] }
  0x19   : > { %s278_s19 = scalar_lea.vmem %s1637_s0, %s986_s14  ;;  %1073 = vmatprep.subr.bf16.mxu1 %v1072_v22  ;;  %v1088_v46 = vpack.c.bf16 %v504_v44, %v503_v43  ;;  %v488_v48 = vld [vmem:[%s1640_s3 + $0x68] sm:$0xff]  ;;  %v506_v50 = vld [vmem:[%s1640_s3 + $0xf8] sm:$0xff]  ;;  %v489_v53 = vld [vmem:[%s1640_s3 + $0x70] sm:$0xff]  ;;  %s267_s14 = sand.u32 1, %s1279_s22  }
  0x1a   : > { %v281_v4 = vld [vmem:[%s278_s19] sm:$0xff]  ;;  %v1090_v51 = vpack.c.bf16 %v488_v48, %v487_v47  ;;  %v1092_v52 = vpack.c.bf16 %v506_v50, %v505_v49  ;;  %v490_v54 = vld [vmem:[%s1640_s3 + $0x78] sm:$0xff]  ;;  %s970_s15 = sshll.u32 %s267_s14, 5  ;;  %s1591_s24 = scalar_lea.sflag [#allocation3], %s267_s14 }
  0x1b   : > { %v297_v5 = vcombine.high %v281_v4, %v281_v4  ;;  %v1094_v55 = vpack.c.bf16 %v490_v54, %v489_v53  ;;  %s269_s16 = scalar_lea.vmem [#allocation2], %s970_s15 }
  0x1c   : > { %1075 = vmatpush3.bf16.msra.mxu1 %v1074_v27  ;;  %s886_s17 = sshll.u32 %s269_s16, 4  ;;  %s1582_s17 = int_to_ptr.vmem [resolvable:$true] %s886_s17 }
  0x1d   : > { %973 = vmatprep.subr.msk.mxu0 %vm305_vm0, %v297_v5  ;;  %1077 = vmatprep.subr.bf16.mxu1 %v1076_v28  ;;  %s1217_s28 = scalar_lea.vmem %s1582_s17, 512  ;;  %p1224_p1 = scmp.lt.s32.totalorder %s1582_s17, %s1222_s8 }
  0x1e   : > { %974 = vmatpush1.msk.msra.mxu0 %vm305_vm0, %v281_v4  ;;  %p1218_p12 = scmp.ne.s32.totalorder %s1582_s17, %s1217_s28  ;;  %p1225_p2 = scmp.lt.s32.totalorder %s1223_s11, %s1217_s28 }
  0x1f   : > { %975 = vmatmul.mubr.msk.f32.vlgmr.msra.gmra.mrb[0].mxu0 %vm298_vm1, %v282_v6  ;;  %1097 = vmatprep.subr.bf16.mxu0 %v1064_v10 }
  0x20   : > { %380 = vmatprep.mubr.f32.mxu0 %v1297_v0  ;;  %1099 = vmatpush3.bf16.msra.mxu0 %v1066_v13  ;;  %p1219_p13 = pnand %p1218_p12, %p1377_p4  ;;  %p1226_p3 = por %p1225_p2, %p1224_p1 }
  0x21   : > { %1101 = vmatprep.subr.bf16.mxu0 %v1068_v17  ;;  %1079 = vmatpush3.bf16.msra.mxu1 %v1078_v33 }
  0x22   : > { %1081 = vmatprep.subr.bf16.mxu1 %v1080_v34  ;;  %p1220_p0 = pneg %p1219_p13 }
  0x23   : > { %976 = vmatmul.mubr.msk.f32.gmra.mrb[2].mxu0 %vm298_vm1, %v283_v7 }
  0x24   : > { %1103 = vmatpush3.bf16.msra.mxu0 %v1070_v21  ;;  %p1227_p5 = pnand %p1226_p3, %p1220_p0 }
  0x25   : > { %1105 = vmatprep.subr.bf16.mxu0 %v1072_v22  ;;  %1083 = vmatpush3.bf16.msra.mxu1 %v1082_v39 }
  0x26   : > { %1085 = vmatprep.subr.bf16.mxu1 %v1084_v40 }
  0x28   : > { %1107 = vmatpush3.bf16.msra.mxu0 %v1074_v27 }
  0x29   : > { %1109 = vmatprep.subr.bf16.mxu0 %v1076_v28  ;;  %1087 = vmatpush3.bf16.msra.mxu1 %v1086_v45 }
  0x2a   : > { %1089 = vmatprep.subr.bf16.mxu1 %v1088_v46 }
  0x2c   : > { %1111 = vmatpush3.bf16.msra.mxu0 %v1078_v33 }
  0x2d   : > { %1113 = vmatprep.subr.bf16.mxu0 %v1080_v34  ;;  %1091 = vmatpush3.bf16.msra.mxu1 %v1090_v51 }
  0x2e   : > { %1093 = vmatprep.subr.bf16.mxu1 %v1092_v52 }
  0x30   : > { %1115 = vmatpush3.bf16.msra.mxu0 %v1082_v39 }
  0x31   : > { %1117 = vmatprep.subr.bf16.mxu0 %v1084_v40  ;;  %1095 = vmatpush3.bf16.msra.mxu1 %v1094_v55 }
  0x34   : > { %1119 = vmatpush3.bf16.msra.mxu0 %v1086_v45 }
  0x35   : > { %1121 = vmatprep.subr.bf16.mxu0 %v1088_v46 }
  0x38   : > { %1123 = vmatpush3.bf16.msra.mxu0 %v1090_v51 }
  0x39   : > { %1125 = vmatprep.subr.bf16.mxu0 %v1092_v52 }
  0x3c   : > { %1127 = vmatpush3.bf16.msra.mxu0 %v1094_v55 }
  0x8f   : > { %v289_v56 = vpop.permute.xlu0 %288 }
  0x93   : > { %v294_v62 = vpop.permute.xlu0 %293 }
  0xf2   : > { %v376_v57 = vpop.f32.mrb[0].mxu0 }
  0xf3   : > { %v1507_v58 = vadd.f32 %v376_v57, %v289_v56  ;;  %v378_v59 = vpop.f32.mrb[1].mxu0 }
  0xf4   : > { %v1509_v60 = vadd.f32 %v378_v59, %v289_v56 }
  0xf5   : > { %v387_v61 = vand.u32 2147483647, %v1507_v58  ;;  %v439_v15 = vmul.f32 %v1507_v58, %v1507_v58  ;;  %vm459_vm2 = vcmp.ge.f32.partialorder %v1507_v58, 0.0 }
  0xf6   : > { %v388_v63 = vand.u32 2147483647, %v1509_v60  ;;  %v382_v1 = vpop.f32.mrb[2].mxu0  ;;  %v440_v16 = vmul.f32 %v1509_v60, %v1509_v60  ;;  %vm460_vm3 = vcmp.ge.f32.partialorder %v1509_v60, 0.0 }
  0xf7   : > { %v391_v2 = vmul.f32 0.23164189, %v387_v61  ;;  %v1513_v3 = vadd.f32 %v382_v1, %v294_v62  ;;  %v384_v4 = vpop.f32.mrb[3].mxu0  ;;  %v443_v18 = vmul.f32 -0.5, %v439_v15 }
  0xf8   : > { %v392_v5 = vmul.f32 0.23164189, %v388_v63  ;;  %v1515_v6 = vadd.f32 %v384_v4, %v294_v62  ;;  %v444_v22 = vmul.f32 -0.5, %v440_v16 }
  0xf9   : > { %v395_v7 = vadd.f32 1.0, %v391_v2  ;;  %v389_v8 = vand.u32 2147483647, %v1513_v3  ;;  %v441_v19 = vmul.f32 %v1513_v3, %v1513_v3  ;;  %v447_v27 = vmul.f32 1.442695, %v443_v18 }
  0xfa   : > { %v396_v9 = vadd.f32 1.0, %v392_v5  ;;  %v390_v10 = vand.u32 2147483647, %v1515_v6  ;;  %v442_v23 = vmul.f32 %v1515_v6, %v1515_v6  ;;  %v449_v33 = vmul.f32 1.442695, %v444_v22 }
  0xfb   : > { %1197 = vrcp.f32 %v395_v7  ;;  %v393_v11 = vmul.f32 0.23164189, %v389_v8  ;;  %v445_v28 = vmul.f32 -0.5, %v441_v19  ;;  %vm461_vm4 = vcmp.ge.f32.partialorder %v1513_v3, 0.0 }
  0xfc   : > { %v394_v12 = vmul.f32 0.23164189, %v390_v10  ;;  %1199 = vrcp.f32 %v396_v9  ;;  %v446_v34 = vmul.f32 -0.5, %v442_v23  ;;  %vm462_vm5 = vcmp.ge.f32.partialorder %v1515_v6, 0.0 }
  0xfd   : > { %v397_v13 = vadd.f32 1.0, %v393_v11  ;;  %v451_v39 = vmul.f32 1.442695, %v445_v28 }
  0xfe   : > { %v398_v14 = vadd.f32 1.0, %v394_v12  ;;  %v453_v44 = vmul.f32 1.442695, %v446_v34 }
  0xff   : > { %1201 = vrcp.f32 %v397_v13 }
 0x100   : > { %1203 = vrcp.f32 %v398_v14 }
 0x101   : > { %1205 = vpow2.f32 %v447_v27 }
 0x102   : > { %1207 = vpow2.f32 %v449_v33 }
 0x103   : > { %1209 = vpow2.f32 %v451_v39 }
 0x104   : > { %1211 = vpow2.f32 %v453_v44 }
 0x105   : > { %v1198_v17 = vpop.eup %1197 }
 0x106   : > { %v403_v20 = vmul.f32 0.5307027, %v1198_v17  ;;  %v1200_v21 = vpop.eup %1199 }
 0x107   : > { %v404_v24 = vmul.f32 0.5307027, %v1200_v21 }
 0x108   : > { %v407_v25 = vadd.f32 -0.72657603, %v403_v20 }
 0x109   : > { %v1202_v26 = vpop.eup %1201  ;;  %v408_v29 = vadd.f32 -0.72657603, %v404_v24 }
 0x10a   : > { %v411_v30 = vmul.f32 %v1198_v17, %v407_v25  ;;  %v405_v31 = vmul.f32 0.5307027, %v1202_v26  ;;  %v1204_v32 = vpop.eup %1203 }
 0x10b   : > { %v412_v35 = vmul.f32 %v1200_v21, %v408_v29  ;;  %v406_v37 = vmul.f32 0.5307027, %v1204_v32  ;;  %v1206_v63 = vpop.eup %1205 }
 0x10c   : > { %v415_v36 = vadd.f32 0.7107069, %v411_v30  ;;  %v409_v38 = vadd.f32 -0.72657603, %v405_v31  ;;  %v1208_v7 = vpop.eup %1207  ;;  %v671_v31 = vld [vmem:[%s1641_s4] sm:$0xff] }
 0x10d   : > { %v416_v40 = vadd.f32 0.7107069, %v412_v35  ;;  %v410_v42 = vadd.f32 -0.72657603, %v406_v37  ;;  %v1210_v12 = vpop.eup %1209 }
 0x10e   : > { %v419_v41 = vmul.f32 %v1198_v17, %v415_v36  ;;  %v413_v43 = vmul.f32 %v1202_v26, %v409_v38 }
 0x10f   : > { %v420_v45 = vmul.f32 %v1200_v21, %v416_v40  ;;  %v414_v47 = vmul.f32 %v1204_v32, %v410_v42 }
 0x110   : > { %v423_v46 = vadd.f32 -0.14224836, %v419_v41  ;;  %v417_v48 = vadd.f32 0.7107069, %v413_v43 }
 0x111   : > { %v424_v49 = vadd.f32 -0.14224836, %v420_v45  ;;  %v418_v51 = vadd.f32 0.7107069, %v414_v47 }
 0x112   : > { %v427_v50 = vmul.f32 %v1198_v17, %v423_v46  ;;  %v421_v52 = vmul.f32 %v1202_v26, %v417_v48 }
 0x113   : > { %v428_v53 = vmul.f32 %v1200_v21, %v424_v49  ;;  %v422_v55 = vmul.f32 %v1204_v32, %v418_v51 }
 0x114   : > { %v431_v54 = vadd.f32 0.1274148, %v427_v50  ;;  %v425_v56 = vadd.f32 -0.14224836, %v421_v52 }
 0x115   : > { %v432_v57 = vadd.f32 0.1274148, %v428_v53  ;;  %v426_v61 = vadd.f32 -0.14224836, %v422_v55 }
 0x116   : > { %v435_v59 = vmul.f32 %v1198_v17, %v431_v54  ;;  %v429_v62 = vmul.f32 %v1202_v26, %v425_v56  ;;  %v1212_v17 = vpop.eup %1211 }
 0x117   : > { %v436_v1 = vmul.f32 %v1200_v21, %v432_v57  ;;  %v430_v4 = vmul.f32 %v1204_v32, %v426_v61 }
 0x118   : > { %v455_v2 = vmul.f32 %v1206_v63, %v435_v59  ;;  %v433_v5 = vadd.f32 0.1274148, %v429_v62  ;;  %v769_v62 = vlaneseq }
 0x119   : > { %v456_v8 = vmul.f32 %v1208_v7, %v436_v1  ;;  %v434_v10 = vadd.f32 0.1274148, %v430_v4 }
 0x11a   : > { %v463_v9 = vsub.f32 1.0, %v455_v2  ;;  %v437_v11 = vmul.f32 %v1202_v26, %v433_v5  ;;  %v770_v63 = vshrl.u32 %v769_v62, 7 }
 0x11b   : > { %v464_v13 = vsub.f32 1.0, %v456_v8  ;;  %v438_v15 = vmul.f32 %v1204_v32, %v434_v10  ;;  %v673_v32 = vld [vmem:[%s1641_s4 + $0x10] sm:$0xff] }
 0x11c   : > { %v467_v14 = vsel %vm459_vm2, %v463_v9, %v455_v2  ;;  %v457_v16 = vmul.f32 %v1210_v12, %v437_v11  ;;  %v1130_v33 = vpack.c.bf16 %v673_v32, %v671_v31  ;;  %v771_v1 = vsub.s32 0, %v770_v63  ;;  %v767_v2 = vld [vmem:[%s1642_s5] sm:$0x3] }
 0x11d   : > { %v468_v18 = vsel %vm460_vm3, %v464_v13, %v456_v8  ;;  %v1530_v19 = vmul.f32 %v467_v14, %v1507_v58  ;;  %v458_v20 = vmul.f32 %v1212_v17, %v438_v15  ;;  %v775_v4 = vsub.s32 1, %v770_v63 }
 0x11e   : > { %v465_v21 = vsub.f32 1.0, %v457_v16  ;;  %v1533_v22 = vmul.f32 %v468_v18, %v1509_v60  ;;  %v772_v5 = vrot.slane %v767_v2, %v771_v1 }
 0x11f   : > { %v466_v23 = vsub.f32 1.0, %v458_v20  ;;  %v582_v58 = vmul.f32 %v1530_v19, %v1530_v19  ;;  %v776_v8 = vrot.slane %v767_v2, %v775_v4 }
 0x120   : > { %v469_v24 = vsel %vm461_vm4, %v465_v21, %v457_v16  ;;  %571 = vmatprep.mubr.f32.mxu1 %v1533_v22  ;;  %v583_v25 = vmul.f32 %v1533_v22, %v1533_v22 }
 0x121   : > { %572 = vmatmul.mubr.f32.vlgmr.msra.gmra.mrb[0].mxu1 %v1530_v19  ;;  %v470_v26 = vsel %vm462_vm5, %v466_v23, %v458_v20  ;;  %v1544_v60 = vmul.f32 %v469_v24, %v1513_v3  ;;  %v672_v3 = vld [vmem:[%s1641_s4 + $0x8] sm:$0xff] }
 0x122   : > { %650 = vmatprep.mubr.f32.mxu0 %v583_v25  ;;  %v1547_v27 = vmul.f32 %v470_v26, %v1515_v6  ;;  %v674_v6 = vld [vmem:[%s1641_s4 + $0x18] sm:$0xff] }
 0x123   : > { %651 = vmatmul.mubr.f32.vlgmr.msra.gmra.mrb[4].mxu0 %v582_v58  ;;  %v584_v29 = vmul.f32 %v1544_v60, %v1544_v60  ;;  %v1128_v30 = vpack.c.bf16 %v674_v6, %v672_v3 }
 0x124   : > { %576 = vmatprep.mubr.f32.mxu1 %v1547_v27  ;;  %v585_v28 = vmul.f32 %v1547_v27, %v1547_v27 }
 0x125   : > { %577 = vmatmul.mubr.f32.gmra.mrb[2].mxu1 %v1544_v60  ;;  %1129 = vmatprep.subr.bf16.mxu1 %v1128_v30 }
 0x126   : > { %655 = vmatprep.mubr.f32.mxu0 %v585_v28  ;;  %746 = vmatprep.mubr.f32.mxu1 %v1297_v0 }
 0x127   : > { %656 = vmatmul.mubr.f32.gmra.mrb[6].mxu0 %v584_v29  ;;  %1133 = vmatprep.subr.bf16.mxu0 %v1128_v30 }
 0x128   : > { %849 = vmatprep.mubr.f32.mxu0 %v1297_v0  ;;  %1131 = vmatpush1.bf16.msra.mxu1 %v1130_v33 }
 0x129   : > { %1135 = vmatpush1.bf16.msra.mxu0 %v1130_v33 }
 0x1f4   : > { %v1020_v34 = vpop.f32.mrb[0].mxu1 }
 0x1f5   : > { %v1021_v35 = vpop.f32.mrb[1].mxu1 }
 0x1f6   : > { %v1022_v36 = vadd.f32 %v1021_v35, %v1020_v34  ;;  %v1058_v37 = vpop.f32.mrb[4].mxu0 }
 0x1f7   : > { %v1059_v38 = vpop.f32.mrb[5].mxu0 }
 0x1f8   : > { %v661_v39 = vmul.f32 %v1022_v36, %v1022_v36  ;;  %v1060_v40 = vadd.f32 %v1059_v38, %v1058_v37  ;;  %v1023_v41 = vpop.f32.mrb[2].mxu1  ;;  %v759_v54 = vsub.f32 0.0, %v1022_v36 }
 0x1f9   : > { %v1024_v42 = vpop.f32.mrb[3].mxu1 }
 0x1fa   : > { %v663_v43 = vsub.f32 %v1060_v40, %v661_v39  ;;  %v1025_v44 = vadd.f32 %v1024_v42, %v1023_v41  ;;  %v1061_v45 = vpop.f32.mrb[6].mxu0 }
 0x1fb   : > { %v1062_v46 = vpop.f32.mrb[7].mxu0 }
 0x1fc   : > { %v665_v47 = vmax.f32 %v663_v43, 0.0  ;;  %v662_v48 = vmul.f32 %v1025_v44, %v1025_v44  ;;  %v1063_v49 = vadd.f32 %v1062_v46, %v1061_v45  ;;  %v760_v57 = vsub.f32 0.0, %v1025_v44 }
 0x1fe   : > { %v667_v50 = vadd.f32 1e-05, %v665_v47  ;;  %v664_v51 = vsub.f32 %v1063_v49, %v662_v48 }
 0x200   : > { %1213 = vrsqrt.f32 %v667_v50  ;;  %v666_v52 = vmax.f32 %v664_v51, 0.0 }
 0x202   : > { %v668_v53 = vadd.f32 1e-05, %v666_v52 }
 0x204   : > { %1215 = vrsqrt.f32 %v668_v53 }
 0x20a   : > { %v1214_v55 = vpop.eup %1213 }
 0x20b   : > { %v761_v56 = vmul.f32 %v1214_v55, %v759_v54  ;;  %977 = vmatmul.mubr.msk.f32.vlgmr.msra.gmra.mrb[4].mxu1 %vm675_vm6, %v1214_v55 }
 0x20c   : > { %752 = vmatprep.mubr.f32.mxu1 %v1297_v0 }
 0x20d   : > { %979 = vmatmul.mubr.msk.f32.vlgmr.msra.gmra.mrb[8].mxu0 %vm675_vm6, %v761_v56 }
 0x20e   : > { %v1216_v59 = vpop.eup %1215  ;;  %855 = vmatprep.mubr.f32.mxu0 %v1297_v0 }
 0x20f   : > { %978 = vmatmul.mubr.msk.f32.gmra.mrb[6].mxu1 %vm675_vm6, %v1216_v59  ;;  %v762_v61 = vmul.f32 %v1216_v59, %v760_v57 }
 0x211   : > { %980 = vmatmul.mubr.msk.f32.gmra.mrb[10].mxu0 %vm675_vm6, %v762_v61 }
 0x2de   : > { %v748_v7 = vpop.f32.mrb[4].mxu1 }
 0x2df   : > { %v750_v9 = vpop.f32.mrb[5].mxu1  ;;  %v763_v0 = vmul.f32 %v748_v7, %v1530_v19 }
 0x2e0   : > { %v851_v10 = vpop.f32.mrb[8].mxu0  ;;  %v764_v13 = vmul.f32 %v750_v9, %v1533_v22 }
 0x2e1   : > { %v852_v11 = vadd.f32 %v851_v10, %v772_v5  ;;  %v853_v12 = vpop.f32.mrb[9].mxu0 }
 0x2e2   : > { %v854_v14 = vadd.f32 %v853_v12, %v776_v8  ;;  %v754_v15 = vpop.f32.mrb[6].mxu1 }
 0x2e3   : > { %v862_v16 = vadd.f32 %v852_v11, %v763_v0  ;;  %v756_v17 = vpop.f32.mrb[7].mxu1  ;;  %v765_v21 = vmul.f32 %v754_v15, %v1544_v60 }
 0x2e4   : > { %v863_v18 = vadd.f32 %v854_v14, %v764_v13  ;;  %v857_v20 = vpop.f32.mrb[10].mxu0  ;;  %v766_v24 = vmul.f32 %v756_v17, %v1547_v27 }
 0x2e5   : > { %866 = vst [vmem:[%s269_s16] sm:$0xff] %v862_v16  ;;  %v858_v23 = vadd.f32 %v857_v20, %v772_v5  ;;  %v859_v19 = vpop.f32.mrb[11].mxu0 }
 0x2e6   : > { %867 = vst [vmem:[%s269_s16 + $0x8] sm:$0xff] %v863_v18  ;;  %v860_v22 = vadd.f32 %v859_v19, %v776_v8 }
 0x2e7   : > { %v864_v25 = vadd.f32 %v858_v23, %v765_v21 }
 0x2e8   : > { %v865_v58 = vadd.f32 %v860_v22, %v766_v24 }
 0x2e9   : > { %868 = vst [vmem:[%s269_s16 + $0x10] sm:$0xff] %v864_v25 }
 0x2ea   : > { %869 = vst [vmem:[%s269_s16 + $0x18] sm:$0xff] %v865_v58 }
 0x2eb   : > { %1230 = shalt.err (!%p1227_p5)
}
 0x2ec   : > { %s1231_s12 = scalar_lea.hbm %s1587_s27, 512  ;;  %s1235_s15 = scalar_lea.hbm %s1643_s6, 1024 }
 0x2ed   : > { %p1232_p6 = scmp.ne.s32.totalorder %s1587_s27, %s1231_s12  ;;  %p1236_p10 = scmp.lt.u32.totalorder %s1587_s27, %s1643_s6 }
 0x2ee   : > { %p1237_p11 = scmp.lt.u32.totalorder %s1235_s15, %s1231_s12  ;;  %p1239_p13 = scmp.lt.u32.totalorder %s1231_s12, %s1587_s27 }
 0x2ef   : > { %p1233_p7 = pnand %p1232_p6, %p1377_p4 }
 0x2f0   : > { %p1238_p12 = por %p1237_p11, %p1236_p10 }
 0x2f1   : > { %p1234_p9 = pneg %p1233_p7 }
 0x2f2   : > { %p1240_p0 = por %p1239_p13, %p1238_p12 }
 0x2f4   : > { %p1241_p1 = pnand %p1240_p0, %p1234_p9 }
 0x2f6   : > { %1244 = shalt.err (!%p1241_p1)
}
 0x2f7   : > { %s1300_s19 = smov 256   ;;  %s1301_s20 = smov 16  }
 0x2f8   : > { %1136 = dma.vmem_to_hbm [thread:$0]  (%p1377_p4), %s1582_s17, 512, %s1587_s27, %s1591_s24, %s1300_s19, %s1300_s19, %s1301_s20  }
 0x2f9 PF: > { %p1142_p2 = scmp.ge.s32.totalorder %s1295_s26, 2  ;;  %s901_s28 = sand.u32 1, %s1275_s21  }
 0x2fa   : > { %s902_s30 = scalar_lea.sflag [#allocation3], %s901_s28 }
 0x2fb   : > { %p1139_p3 = pnand %p1142_p2, %p1384_p8 }
 0x2fd   : > { %1270 = dma.done.wait (!%p1139_p3), %s902_s30, 512  }
 0x2fe   : > { %1272 = vsyncadd (!%p1139_p3), %s902_s30, 4294966784  ;;  %s19_s26 = sadd.s32 1, %s1295_s26   ;;  %s1646_s21 = smov %s1279_s22 }
 0x2ff   : > { %p16_p5 = scmp.ge.s32.totalorder %s19_s26, 4   ;;  %s1647_s22 = smov %s1283_s23 }
 0x300   : > { %s1648_s23 = smov %s1390_s10  ;;  %s1649_s24 = smov %s1291_s25 }
 0x301   : > { %s1650_s25 = smov %s1652_s29  ;;  %18 = sbr.rel (!%p16_p5) target bundleno = 4 (0x4), region = 79 }
 0x308   :  { %907 = vsyncpa [#allocation3], 1 }
 0x309   :  { %909 = vsyncpa [#allocation3 + $0x1], 1 }

</bundles_post_ra>
